<compile_context>
chip_gen: v7x
topology: tpu7x:2x2x1
jax: 0.10.0
libtpu: 0.0.40
codegen_flags: <defaults>
</compile_context>

<pallas_src>
import jax
import jax.numpy as jnp
from jax.experimental import pallas as pl
from jax.experimental.pallas import tpu as pltpu


_LANES = 128
_SUBLANES = 8
_PAD_LOGIT = -60.0   # clipped to -_CLIP in-kernel; yields exactly-zero contributions
_CLIP = 30.0         # |logit| clamp: keeps exp(-x) finite, mimics the 1e-12 loss floor


def _fold_rows(x):
    """[rows, 128] -> [8, 128] by summing static 8-row slices (pure VPU adds)."""
    rows = x.shape[0]
    acc = x[0:_SUBLANES]
    for j in range(1, rows // _SUBLANES):
        acc = acc + x[j * _SUBLANES:(j + 1) * _SUBLANES]
    return acc


def _make_kernel(n_valid_tiles, needs_guard):
    def kernel(ph_ref, th_ref, pr_ref, tr_ref,
               mask_ref, npos_ref, gts_ref, regr_ref):
        # ph_ref/th_ref: (1, C, TR, 128) heatmap logits / targets (one batch, one tile)
        # pr_ref/tr_ref: (1, R, TR, 128) regression pred / target
        # outputs: (1, 1, 8, 128) accumulators, resident across the row-tile grid axis.
        @pl.when(pl.program_id(2) == 0)
        def _init():
            mask_ref[...] = jnp.zeros_like(mask_ref)
            npos_ref[...] = jnp.zeros_like(npos_ref)
            gts_ref[...] = jnp.zeros_like(gts_ref)
            regr_ref[...] = jnp.zeros_like(regr_ref)

        def _accumulate():
            num_cls = ph_ref.shape[1]
            num_reg = pr_ref.shape[1]

            mask_c = npos_c = gt_c = None
            for c in range(num_cls):        # per-channel streaming: small live set
                x = ph_ref[0, c].astype(jnp.float32)      # [TR, 128]
                gt = th_ref[0, c].astype(jnp.float32)     # [TR, 128]
                x = jnp.clip(x, -_CLIP, _CLIP)
                e = jnp.exp(-x)
                one_p_e = 1.0 + e
                pred = 1.0 / one_p_e                      # sigmoid(x)
                log_pred = -jnp.log(one_p_e)              # log(sigmoid(x))
                log_1m_pred = log_pred - x                # log(1 - sigmoid(x))

                pos_ind = (gt == 1.0).astype(jnp.float32)
                omp = 1.0 - pred
                pos_loss = log_pred * (omp * omp * omp) * pos_ind
                # (1-gt)^4 is exactly 0 where gt == 1 (gt in [0, 1]), so the explicit
                # gt.lt(1) mask of the PyTorch reference is redundant and omitted.
                g1 = 1.0 - gt
                g2 = g1 * g1
                neg_loss = log_1m_pred * (pred * pred * pred) * (g2 * g2)
                contrib = pos_loss + neg_loss

                if c == 0:
                    mask_c, npos_c, gt_c = contrib, pos_ind, gt
                else:
                    mask_c = mask_c + contrib
                    npos_c = npos_c + pos_ind
                    gt_c = gt_c + gt

            abs_c = None
            for r in range(num_reg):
                d = jnp.abs(pr_ref[0, r].astype(jnp.float32)
                            - tr_ref[0, r].astype(jnp.float32))
                abs_c = d if r == 0 else abs_c + d
            regr_c = abs_c * gt_c            # sum_r|dpred| * sum_c(gt), per location

            mask_ref[0, 0] = mask_ref[0, 0] + _fold_rows(mask_c)
            npos_ref[0, 0] = npos_ref[0, 0] + _fold_rows(npos_c)
            gts_ref[0, 0] = gts_ref[0, 0] + _fold_rows(gt_c)
            regr_ref[0, 0] = regr_ref[0, 0] + _fold_rows(regr_c)

        if needs_guard:
            g = pl.program_id(1) * pl.num_programs(2) + pl.program_id(2)
            pl.when(g < n_valid_tiles)(_accumulate)
        else:
            _accumulate()

    return kernel


def _choose_rows(s_rows, bytes_per_row, budget_bytes=2 << 20, min_tiles=1):
    """Rows per tile: multiple of 8, fits the per-step VMEM budget, ideally divides
    s_rows exactly (no padding copy); prefers >= min_tiles tiles so the row axis can be
    split across TensorCores when the batch is too small to do so."""
    cap = (budget_bytes // bytes_per_row) // _SUBLANES * _SUBLANES
    cap = max(_SUBLANES, min(2048, cap))
    if s_rows <= _SUBLANES:
        return _SUBLANES
    limit = cap
    if min_tiles > 1:
        per_split = -(-s_rows // min_tiles)
        limit = min(limit, max(_SUBLANES, (per_split + 7) // 8 * 8))
    limit = min(limit, (s_rows + 7) // 8 * 8)
    for t in range(limit, _SUBLANES - 1, -_SUBLANES):
        if s_rows % t == 0:
            return t
    # No aligned divisor: fall back and let the wrapper pad the ragged tail
    # (this is the only case that costs an extra HBM copy).
    return limit


def centernet_criterion(predicted_heatmap, predicted_regr, target_heatmap, target_regr,
                        mask_loss_weight=1.0, regr_loss_weight=1.0, size_average=True):
    """CenterNetCriterion.forward (NCHW layout). Returns (loss, mask_loss, regr_loss)."""
    B, C, H, W = predicted_heatmap.shape
    R = predicted_regr.shape[1]
    HW = H * W

    s_rows = -(-HW // _LANES)                       # ceil(HW / 128) sublane rows
    bytes_per_row = _LANES * 4 * (2 * C + 2 * R)    # f32 bytes staged per row, 4 inputs
    rows = _choose_rows(s_rows, bytes_per_row, min_tiles=2 if B == 1 else 1)
    n_t = -(-s_rows // rows)                        # row tiles per image
    s_pad = n_t * rows
    total = s_pad * _LANES

    nsplit = 2 if n_t >= 2 else 1                   # v7x: 2 TensorCores share row tiles
    per = -(-n_t // nsplit)
    needs_guard = (nsplit * per != n_t)

    def prep(x, ch, pad_value):
        x = x.reshape(B, ch, HW).astype(jnp.float32)
        if total != HW:
            # Only ragged shapes pay this copy; aligned shapes reshape for free.
            x = jnp.pad(x, ((0, 0), (0, 0), (0, total - HW)),
                        constant_values=pad_value)
        return x.reshape(B, ch, s_pad, _LANES)

    ph = prep(predicted_heatmap, C, _PAD_LOGIT)
    th = prep(target_heatmap, C, 0.0)
    pr = prep(predicted_regr, R, 0.0)
    trg = prep(target_regr, R, 0.0)

    if needs_guard:
        def row_block(s, t):
            return jnp.minimum(s * per + t, n_t - 1)   # clamp; compute skipped in-kernel
    else:
        def row_block(s, t):
            return s * per + t

    hm_spec = pl.BlockSpec((1, C, rows, _LANES),
                           lambda b, s, t: (b, 0, row_block(s, t), 0))
    rg_spec = pl.BlockSpec((1, R, rows, _LANES),
                           lambda b, s, t: (b, 0, row_block(s, t), 0))
    acc_spec = pl.BlockSpec((1, 1, _SUBLANES, _LANES),
                            lambda b, s, t: (b, s, 0, 0))   # resident across t

    acc_shape = jax.ShapeDtypeStruct((B, nsplit, _SUBLANES, _LANES), jnp.float32)
    out_shape = (acc_shape, acc_shape, acc_shape, acc_shape)

    in_step_bytes = rows * _LANES * 4 * (2 * C + 2 * R)
    vmem_limit = int(min(28 << 20, max(12 << 20, 8 * in_step_bytes + (4 << 20))))

    partials = pl.pallas_call(
        _make_kernel(n_t, needs_guard),
        out_shape=out_shape,
        grid_spec=pltpu.PrefetchScalarGridSpec(
            num_scalar_prefetch=0,
            grid=(B, nsplit, per),
            in_specs=[hm_spec, hm_spec, rg_spec, rg_spec],
            out_specs=(acc_spec, acc_spec, acc_spec, acc_spec),
        ),
        compiler_params=pltpu.CompilerParams(
            dimension_semantics=("parallel", "parallel", "arbitrary"),
            vmem_limit_bytes=vmem_limit,
        ),
    )(ph, th, pr, trg)

    mask_sum = jnp.sum(partials[0])   # positive_loss + negative_loss (positive term is
    num_pos = jnp.sum(partials[1])    #  exactly 0 when num_pos == 0, so one sum suffices)
    gt_sum = jnp.sum(partials[2])
    regr_num = jnp.sum(partials[3])

    mask_loss = jnp.where(num_pos == 0.0, -mask_sum, -mask_sum / num_pos)
    mask_loss = mask_loss * mask_loss_weight
    # Matches the reference: no guard against sum(gt) == 0 (same NaN behavior).
    regr_loss = (regr_num / gt_sum) * regr_loss_weight

    loss = mask_loss + regr_loss
    if not size_average:
        loss = loss * B
    return loss, mask_loss, regr_loss


def _reference_criterion(predicted_heatmap, predicted_regr, target_heatmap, target_regr,
                         mask_loss_weight=1.0, regr_loss_weight=1.0, size_average=True):
    """Pure-JAX reference mirroring the PyTorch module."""
    pred = jax.nn.sigmoid(predicted_heatmap.astype(jnp.float32))
    gt = target_heatmap.astype(jnp.float32)
    pos = (gt == 1.0).astype(jnp.float32)
    neg = (gt < 1.0).astype(jnp.float32)
    nw = (1.0 - gt) ** 4
    p_loss = jnp.sum(jnp.log(pred + 1e-12) * (1.0 - pred) ** 3 * pos)
    n_loss = jnp.sum(jnp.log(1.0 - pred + 1e-12) * pred ** 3 * nw * neg)
    num_pos = jnp.sum(pos)
    mask_loss = jnp.where(num_pos == 0.0, -n_loss, -(p_loss + n_loss) / num_pos)
    mask_loss = mask_loss * mask_loss_weight
    regr_loss = jnp.sum(
        jnp.abs(predicted_regr - target_regr).sum(axis=1, keepdims=True) * gt
    ) / jnp.sum(gt)
    regr_loss = regr_loss * regr_loss_weight
    loss = mask_loss + regr_loss
    if not size_average:
        loss = loss * predicted_heatmap.shape[0]
    return loss, mask_loss, regr_loss


if __name__ == "__main__":
    key = jax.random.PRNGKey(0)
    k1, k2, k3, k4 = jax.random.split(key, 4)

    B, C, H, W = 2, 4, 16, 16   # num_classes = 4

    predicted_heatmap = jax.random.normal(k1, (B, C, H, W), dtype=jnp.float32)   # logits
    predicted_regr = jax.random.normal(k2, (B, 2, H, W), dtype=jnp.float32)
    target_heatmap = jax.random.uniform(k3, (B, C, H, W), dtype=jnp.float32,
                                        minval=0.0, maxval=0.99)
    # plant exact 1.0 centers so num_pos > 0 (exercises the main branch of neg_loss)
    target_heatmap = target_heatmap.at[:, :, 4, 4].set(1.0)
    target_heatmap = target_heatmap.at[:, :, 10, 7].set(1.0)
    target_regr = jax.random.uniform(k4, (B, 2, H, W), dtype=jnp.float32)

    loss, mask_loss, regr_loss = centernet_criterion(
        predicted_heatmap, predicted_regr, target_heatmap, target_regr)
    jax.block_until_ready((loss, mask_loss, regr_loss))

    ref_loss, ref_mask, ref_regr = _reference_criterion(
        predicted_heatmap, predicted_regr, target_heatmap, target_regr)

    assert jnp.allclose(loss, ref_loss, rtol=1e-4, atol=1e-4), (loss, ref_loss)
    assert jnp.allclose(mask_loss, ref_mask, rtol=1e-4, atol=1e-4), (mask_loss, ref_mask)
    assert jnp.allclose(regr_loss, ref_regr, rtol=1e-4, atol=1e-4), (regr_loss, ref_regr)

    print("KERNEL_OK")
</pallas_src>

<mosaic_0001>
module attributes {stable_mosaic.version = 11 : i64} {
  func.func @kernel(%arg0: i32, %arg1: i32, %arg2: i32, %arg3: memref<1x4x8x128xf32, #tpu.memory_space<vmem>>, %arg4: memref<1x4x8x128xf32, #tpu.memory_space<vmem>>, %arg5: memref<1x2x8x128xf32, #tpu.memory_space<vmem>>, %arg6: memref<1x2x8x128xf32, #tpu.memory_space<vmem>>, %arg7: memref<1x1x8x128xf32, #tpu.memory_space<vmem>>, %arg8: memref<1x1x8x128xf32, #tpu.memory_space<vmem>>, %arg9: memref<1x1x8x128xf32, #tpu.memory_space<vmem>>, %arg10: memref<1x1x8x128xf32, #tpu.memory_space<vmem>>) attributes {dimension_semantics = [#tpu.dimension_semantics<parallel>, #tpu.dimension_semantics<parallel>, #tpu.dimension_semantics<arbitrary>], iteration_bounds = array<i64: 2, 1, 1>, scalar_prefetch = 0 : i64, scratch_operands = 0 : i64, tpu.core_type = #tpu.core_type<tc>, window_params = [{transform_indices = @transform_0, window_bounds = array<i64: 1, 4, 8, 128>}, {transform_indices = @transform_1, window_bounds = array<i64: 1, 4, 8, 128>}, {transform_indices = @transform_2, window_bounds = array<i64: 1, 2, 8, 128>}, {transform_indices = @transform_3, window_bounds = array<i64: 1, 2, 8, 128>}, {transform_indices = @transform_4, window_bounds = array<i64: 1, 1, 8, 128>}, {transform_indices = @transform_5, window_bounds = array<i64: 1, 1, 8, 128>}, {transform_indices = @transform_6, window_bounds = array<i64: 1, 1, 8, 128>}, {transform_indices = @transform_7, window_bounds = array<i64: 1, 1, 8, 128>}]} {
    %c0_i32 = arith.constant 0 : i32
    %0 = arith.cmpi eq, %arg2, %c0_i32 : i32
    %1 = arith.extui %0 : i1 to i32
    %c0_i32_0 = arith.constant 0 : i32
    %2 = arith.cmpi ne, %1, %c0_i32_0 : i32
    scf.if %2 {
      %cst_112 = arith.constant 0.000000e+00 : f32
      %202 = vector.broadcast %cst_112 : f32 to vector<1x1x8x128xf32>
      %c0_113 = arith.constant 0 : index
      %c0_114 = arith.constant 0 : index
      %c0_115 = arith.constant 0 : index
      %c0_116 = arith.constant 0 : index
      %203 = vector.load %arg7[%c0_113, %c0_114, %c0_115, %c0_116] : memref<1x1x8x128xf32, #tpu.memory_space<vmem>>, vector<1x1x8x128xf32>
      tpu.vector_store %arg7[%c0_113, %c0_114, %c0_115, %c0_116], %202 {strides = array<i32>} : memref<1x1x8x128xf32, #tpu.memory_space<vmem>>, vector<1x1x8x128xf32>,
      %cst_117 = arith.constant 0.000000e+00 : f32
      %204 = vector.broadcast %cst_117 : f32 to vector<1x1x8x128xf32>
      %c0_118 = arith.constant 0 : index
      %c0_119 = arith.constant 0 : index
      %c0_120 = arith.constant 0 : index
      %c0_121 = arith.constant 0 : index
      %205 = vector.load %arg8[%c0_118, %c0_119, %c0_120, %c0_121] : memref<1x1x8x128xf32, #tpu.memory_space<vmem>>, vector<1x1x8x128xf32>
      tpu.vector_store %arg8[%c0_118, %c0_119, %c0_120, %c0_121], %204 {strides = array<i32>} : memref<1x1x8x128xf32, #tpu.memory_space<vmem>>, vector<1x1x8x128xf32>,
      %cst_122 = arith.constant 0.000000e+00 : f32
      %206 = vector.broadcast %cst_122 : f32 to vector<1x1x8x128xf32>
      %c0_123 = arith.constant 0 : index
      %c0_124 = arith.constant 0 : index
      %c0_125 = arith.constant 0 : index
      %c0_126 = arith.constant 0 : index
      %207 = vector.load %arg9[%c0_123, %c0_124, %c0_125, %c0_126] : memref<1x1x8x128xf32, #tpu.memory_space<vmem>>, vector<1x1x8x128xf32>
      tpu.vector_store %arg9[%c0_123, %c0_124, %c0_125, %c0_126], %206 {strides = array<i32>} : memref<1x1x8x128xf32, #tpu.memory_space<vmem>>, vector<1x1x8x128xf32>,
      %cst_127 = arith.constant 0.000000e+00 : f32
      %208 = vector.broadcast %cst_127 : f32 to vector<1x1x8x128xf32>
      %c0_128 = arith.constant 0 : index
      %c0_129 = arith.constant 0 : index
      %c0_130 = arith.constant 0 : index
      %c0_131 = arith.constant 0 : index
      %209 = vector.load %arg10[%c0_128, %c0_129, %c0_130, %c0_131] : memref<1x1x8x128xf32, #tpu.memory_space<vmem>>, vector<1x1x8x128xf32>
      tpu.vector_store %arg10[%c0_128, %c0_129, %c0_130, %c0_131], %208 {strides = array<i32>} : memref<1x1x8x128xf32, #tpu.memory_space<vmem>>, vector<1x1x8x128xf32>,
    } else {
    }
    %c0 = arith.constant 0 : index
    %c0_1 = arith.constant 0 : index
    %c0_2 = arith.constant 0 : index
    %c0_3 = arith.constant 0 : index
    %3 = vector.load %arg3[%c0, %c0_1, %c0_2, %c0_3] : memref<1x4x8x128xf32, #tpu.memory_space<vmem>>, vector<1x1x8x128xf32>
    %4 = vector.shape_cast %3 : vector<1x1x8x128xf32> to vector<8x128xf32>
    %c0_4 = arith.constant 0 : index
    %c0_5 = arith.constant 0 : index
    %c0_6 = arith.constant 0 : index
    %c0_7 = arith.constant 0 : index
    %5 = vector.load %arg4[%c0_4, %c0_5, %c0_6, %c0_7] : memref<1x4x8x128xf32, #tpu.memory_space<vmem>>, vector<1x1x8x128xf32>
    %6 = vector.shape_cast %5 : vector<1x1x8x128xf32> to vector<8x128xf32>
    %cst = arith.constant -3.000000e+01 : f32
    %cst_8 = arith.constant 3.000000e+01 : f32
    %7 = vector.broadcast %cst : f32 to vector<8x128xf32>
    %8 = arith.maximumf %7, %4 : vector<8x128xf32>
    %9 = vector.broadcast %cst_8 : f32 to vector<8x128xf32>
    %10 = arith.minimumf %9, %8 : vector<8x128xf32>
    %cst_9 = arith.constant 0.000000e+00 : f32
    %11 = vector.broadcast %cst_9 : f32 to vector<8x128xf32>
    %12 = arith.subf %11, %10 : vector<8x128xf32>
    %13 = math.exp %12 : vector<8x128xf32>
    %cst_10 = arith.constant 1.000000e+00 : f32
    %14 = vector.broadcast %cst_10 : f32 to vector<8x128xf32>
    %15 = arith.addf %14, %13 : vector<8x128xf32>
    %cst_11 = arith.constant 1.000000e+00 : f32
    %16 = vector.broadcast %cst_11 : f32 to vector<8x128xf32>
    %17 = arith.divf %16, %15 : vector<8x128xf32>
    %18 = math.log %15 : vector<8x128xf32>
    %cst_12 = arith.constant 0.000000e+00 : f32
    %19 = vector.broadcast %cst_12 : f32 to vector<8x128xf32>
    %20 = arith.subf %19, %18 : vector<8x128xf32>
    %21 = arith.subf %20, %10 : vector<8x128xf32>
    %cst_13 = arith.constant 1.000000e+00 : f32
    %22 = vector.broadcast %cst_13 : f32 to vector<8x128xf32>
    %23 = arith.cmpf oeq, %6, %22 : vector<8x128xf32>
    %24 = arith.extui %23 : vector<8x128xi1> to vector<8x128xi32>
    %25 = arith.sitofp %24 : vector<8x128xi32> to vector<8x128xf32>
    %cst_14 = arith.constant 1.000000e+00 : f32
    %26 = vector.broadcast %cst_14 : f32 to vector<8x128xf32>
    %27 = arith.subf %26, %17 : vector<8x128xf32>
    %28 = arith.mulf %27, %27 : vector<8x128xf32>
    %29 = arith.mulf %28, %27 : vector<8x128xf32>
    %30 = arith.mulf %20, %29 : vector<8x128xf32>
    %31 = arith.mulf %30, %25 : vector<8x128xf32>
    %cst_15 = arith.constant 1.000000e+00 : f32
    %32 = vector.broadcast %cst_15 : f32 to vector<8x128xf32>
    %33 = arith.subf %32, %6 : vector<8x128xf32>
    %34 = arith.mulf %33, %33 : vector<8x128xf32>
    %35 = arith.mulf %17, %17 : vector<8x128xf32>
    %36 = arith.mulf %35, %17 : vector<8x128xf32>
    %37 = arith.mulf %21, %36 : vector<8x128xf32>
    %38 = arith.mulf %34, %34 : vector<8x128xf32>
    %39 = arith.mulf %37, %38 : vector<8x128xf32>
    %40 = arith.addf %31, %39 : vector<8x128xf32>
    %c0_16 = arith.constant 0 : index
    %c1 = arith.constant 1 : index
    %c0_17 = arith.constant 0 : index
    %c0_18 = arith.constant 0 : index
    %41 = vector.load %arg3[%c0_16, %c1, %c0_17, %c0_18] : memref<1x4x8x128xf32, #tpu.memory_space<vmem>>, vector<1x1x8x128xf32>
    %42 = vector.shape_cast %41 : vector<1x1x8x128xf32> to vector<8x128xf32>
    %c0_19 = arith.constant 0 : index
    %c1_20 = arith.constant 1 : index
    %c0_21 = arith.constant 0 : index
    %c0_22 = arith.constant 0 : index
    %43 = vector.load %arg4[%c0_19, %c1_20, %c0_21, %c0_22] : memref<1x4x8x128xf32, #tpu.memory_space<vmem>>, vector<1x1x8x128xf32>
    %44 = vector.shape_cast %43 : vector<1x1x8x128xf32> to vector<8x128xf32>
    %cst_23 = arith.constant -3.000000e+01 : f32
    %cst_24 = arith.constant 3.000000e+01 : f32
    %45 = vector.broadcast %cst_23 : f32 to vector<8x128xf32>
    %46 = arith.maximumf %45, %42 : vector<8x128xf32>
    %47 = vector.broadcast %cst_24 : f32 to vector<8x128xf32>
    %48 = arith.minimumf %47, %46 : vector<8x128xf32>
    %cst_25 = arith.constant 0.000000e+00 : f32
    %49 = vector.broadcast %cst_25 : f32 to vector<8x128xf32>
    %50 = arith.subf %49, %48 : vector<8x128xf32>
    %51 = math.exp %50 : vector<8x128xf32>
    %cst_26 = arith.constant 1.000000e+00 : f32
    %52 = vector.broadcast %cst_26 : f32 to vector<8x128xf32>
    %53 = arith.addf %52, %51 : vector<8x128xf32>
    %cst_27 = arith.constant 1.000000e+00 : f32
    %54 = vector.broadcast %cst_27 : f32 to vector<8x128xf32>
    %55 = arith.divf %54, %53 : vector<8x128xf32>
    %56 = math.log %53 : vector<8x128xf32>
    %cst_28 = arith.constant 0.000000e+00 : f32
    %57 = vector.broadcast %cst_28 : f32 to vector<8x128xf32>
    %58 = arith.subf %57, %56 : vector<8x128xf32>
    %59 = arith.subf %58, %48 : vector<8x128xf32>
    %cst_29 = arith.constant 1.000000e+00 : f32
    %60 = vector.broadcast %cst_29 : f32 to vector<8x128xf32>
    %61 = arith.cmpf oeq, %44, %60 : vector<8x128xf32>
    %62 = arith.extui %61 : vector<8x128xi1> to vector<8x128xi32>
    %63 = arith.sitofp %62 : vector<8x128xi32> to vector<8x128xf32>
    %cst_30 = arith.constant 1.000000e+00 : f32
    %64 = vector.broadcast %cst_30 : f32 to vector<8x128xf32>
    %65 = arith.subf %64, %55 : vector<8x128xf32>
    %66 = arith.mulf %65, %65 : vector<8x128xf32>
    %67 = arith.mulf %66, %65 : vector<8x128xf32>
    %68 = arith.mulf %58, %67 : vector<8x128xf32>
    %69 = arith.mulf %68, %63 : vector<8x128xf32>
    %cst_31 = arith.constant 1.000000e+00 : f32
    %70 = vector.broadcast %cst_31 : f32 to vector<8x128xf32>
    %71 = arith.subf %70, %44 : vector<8x128xf32>
    %72 = arith.mulf %71, %71 : vector<8x128xf32>
    %73 = arith.mulf %55, %55 : vector<8x128xf32>
    %74 = arith.mulf %73, %55 : vector<8x128xf32>
    %75 = arith.mulf %59, %74 : vector<8x128xf32>
    %76 = arith.mulf %72, %72 : vector<8x128xf32>
    %77 = arith.mulf %75, %76 : vector<8x128xf32>
    %78 = arith.addf %69, %77 : vector<8x128xf32>
    %79 = arith.addf %40, %78 : vector<8x128xf32>
    %80 = arith.addf %25, %63 : vector<8x128xf32>
    %81 = arith.addf %6, %44 : vector<8x128xf32>
    %c0_32 = arith.constant 0 : index
    %c2 = arith.constant 2 : index
    %c0_33 = arith.constant 0 : index
    %c0_34 = arith.constant 0 : index
    %82 = vector.load %arg3[%c0_32, %c2, %c0_33, %c0_34] : memref<1x4x8x128xf32, #tpu.memory_space<vmem>>, vector<1x1x8x128xf32>
    %83 = vector.shape_cast %82 : vector<1x1x8x128xf32> to vector<8x128xf32>
    %c0_35 = arith.constant 0 : index
    %c2_36 = arith.constant 2 : index
    %c0_37 = arith.constant 0 : index
    %c0_38 = arith.constant 0 : index
    %84 = vector.load %arg4[%c0_35, %c2_36, %c0_37, %c0_38] : memref<1x4x8x128xf32, #tpu.memory_space<vmem>>, vector<1x1x8x128xf32>
    %85 = vector.shape_cast %84 : vector<1x1x8x128xf32> to vector<8x128xf32>
    %cst_39 = arith.constant -3.000000e+01 : f32
    %cst_40 = arith.constant 3.000000e+01 : f32
    %86 = vector.broadcast %cst_39 : f32 to vector<8x128xf32>
    %87 = arith.maximumf %86, %83 : vector<8x128xf32>
    %88 = vector.broadcast %cst_40 : f32 to vector<8x128xf32>
    %89 = arith.minimumf %88, %87 : vector<8x128xf32>
    %cst_41 = arith.constant 0.000000e+00 : f32
    %90 = vector.broadcast %cst_41 : f32 to vector<8x128xf32>
    %91 = arith.subf %90, %89 : vector<8x128xf32>
    %92 = math.exp %91 : vector<8x128xf32>
    %cst_42 = arith.constant 1.000000e+00 : f32
    %93 = vector.broadcast %cst_42 : f32 to vector<8x128xf32>
    %94 = arith.addf %93, %92 : vector<8x128xf32>
    %cst_43 = arith.constant 1.000000e+00 : f32
    %95 = vector.broadcast %cst_43 : f32 to vector<8x128xf32>
    %96 = arith.divf %95, %94 : vector<8x128xf32>
    %97 = math.log %94 : vector<8x128xf32>
    %cst_44 = arith.constant 0.000000e+00 : f32
    %98 = vector.broadcast %cst_44 : f32 to vector<8x128xf32>
    %99 = arith.subf %98, %97 : vector<8x128xf32>
    %100 = arith.subf %99, %89 : vector<8x128xf32>
    %cst_45 = arith.constant 1.000000e+00 : f32
    %101 = vector.broadcast %cst_45 : f32 to vector<8x128xf32>
    %102 = arith.cmpf oeq, %85, %101 : vector<8x128xf32>
    %103 = arith.extui %102 : vector<8x128xi1> to vector<8x128xi32>
    %104 = arith.sitofp %103 : vector<8x128xi32> to vector<8x128xf32>
    %cst_46 = arith.constant 1.000000e+00 : f32
    %105 = vector.broadcast %cst_46 : f32 to vector<8x128xf32>
    %106 = arith.subf %105, %96 : vector<8x128xf32>
    %107 = arith.mulf %106, %106 : vector<8x128xf32>
    %108 = arith.mulf %107, %106 : vector<8x128xf32>
    %109 = arith.mulf %99, %108 : vector<8x128xf32>
    %110 = arith.mulf %109, %104 : vector<8x128xf32>
    %cst_47 = arith.constant 1.000000e+00 : f32
    %111 = vector.broadcast %cst_47 : f32 to vector<8x128xf32>
    %112 = arith.subf %111, %85 : vector<8x128xf32>
    %113 = arith.mulf %112, %112 : vector<8x128xf32>
    %114 = arith.mulf %96, %96 : vector<8x128xf32>
    %115 = arith.mulf %114, %96 : vector<8x128xf32>
    %116 = arith.mulf %100, %115 : vector<8x128xf32>
    %117 = arith.mulf %113, %113 : vector<8x128xf32>
    %118 = arith.mulf %116, %117 : vector<8x128xf32>
    %119 = arith.addf %110, %118 : vector<8x128xf32>
    %120 = arith.addf %79, %119 : vector<8x128xf32>
    %121 = arith.addf %80, %104 : vector<8x128xf32>
    %122 = arith.addf %81, %85 : vector<8x128xf32>
    %c0_48 = arith.constant 0 : index
    %c3 = arith.constant 3 : index
    %c0_49 = arith.constant 0 : index
    %c0_50 = arith.constant 0 : index
    %123 = vector.load %arg3[%c0_48, %c3, %c0_49, %c0_50] : memref<1x4x8x128xf32, #tpu.memory_space<vmem>>, vector<1x1x8x128xf32>
    %124 = vector.shape_cast %123 : vector<1x1x8x128xf32> to vector<8x128xf32>
    %c0_51 = arith.constant 0 : index
    %c3_52 = arith.constant 3 : index
    %c0_53 = arith.constant 0 : index
    %c0_54 = arith.constant 0 : index
    %125 = vector.load %arg4[%c0_51, %c3_52, %c0_53, %c0_54] : memref<1x4x8x128xf32, #tpu.memory_space<vmem>>, vector<1x1x8x128xf32>
    %126 = vector.shape_cast %125 : vector<1x1x8x128xf32> to vector<8x128xf32>
    %cst_55 = arith.constant -3.000000e+01 : f32
    %cst_56 = arith.constant 3.000000e+01 : f32
    %127 = vector.broadcast %cst_55 : f32 to vector<8x128xf32>
    %128 = arith.maximumf %127, %124 : vector<8x128xf32>
    %129 = vector.broadcast %cst_56 : f32 to vector<8x128xf32>
    %130 = arith.minimumf %129, %128 : vector<8x128xf32>
    %cst_57 = arith.constant 0.000000e+00 : f32
    %131 = vector.broadcast %cst_57 : f32 to vector<8x128xf32>
    %132 = arith.subf %131, %130 : vector<8x128xf32>
    %133 = math.exp %132 : vector<8x128xf32>
    %cst_58 = arith.constant 1.000000e+00 : f32
    %134 = vector.broadcast %cst_58 : f32 to vector<8x128xf32>
    %135 = arith.addf %134, %133 : vector<8x128xf32>
    %cst_59 = arith.constant 1.000000e+00 : f32
    %136 = vector.broadcast %cst_59 : f32 to vector<8x128xf32>
    %137 = arith.divf %136, %135 : vector<8x128xf32>
    %138 = math.log %135 : vector<8x128xf32>
    %cst_60 = arith.constant 0.000000e+00 : f32
    %139 = vector.broadcast %cst_60 : f32 to vector<8x128xf32>
    %140 = arith.subf %139, %138 : vector<8x128xf32>
    %141 = arith.subf %140, %130 : vector<8x128xf32>
    %cst_61 = arith.constant 1.000000e+00 : f32
    %142 = vector.broadcast %cst_61 : f32 to vector<8x128xf32>
    %143 = arith.cmpf oeq, %126, %142 : vector<8x128xf32>
    %144 = arith.extui %143 : vector<8x128xi1> to vector<8x128xi32>
    %145 = arith.sitofp %144 : vector<8x128xi32> to vector<8x128xf32>
    %cst_62 = arith.constant 1.000000e+00 : f32
    %146 = vector.broadcast %cst_62 : f32 to vector<8x128xf32>
    %147 = arith.subf %146, %137 : vector<8x128xf32>
    %148 = arith.mulf %147, %147 : vector<8x128xf32>
    %149 = arith.mulf %148, %147 : vector<8x128xf32>
    %150 = arith.mulf %140, %149 : vector<8x128xf32>
    %151 = arith.mulf %150, %145 : vector<8x128xf32>
    %cst_63 = arith.constant 1.000000e+00 : f32
    %152 = vector.broadcast %cst_63 : f32 to vector<8x128xf32>
    %153 = arith.subf %152, %126 : vector<8x128xf32>
    %154 = arith.mulf %153, %153 : vector<8x128xf32>
    %155 = arith.mulf %137, %137 : vector<8x128xf32>
    %156 = arith.mulf %155, %137 : vector<8x128xf32>
    %157 = arith.mulf %141, %156 : vector<8x128xf32>
    %158 = arith.mulf %154, %154 : vector<8x128xf32>
    %159 = arith.mulf %157, %158 : vector<8x128xf32>
    %160 = arith.addf %151, %159 : vector<8x128xf32>
    %161 = arith.addf %120, %160 : vector<8x128xf32>
    %162 = arith.addf %121, %145 : vector<8x128xf32>
    %163 = arith.addf %122, %126 : vector<8x128xf32>
    %c0_64 = arith.constant 0 : index
    %c0_65 = arith.constant 0 : index
    %c0_66 = arith.constant 0 : index
    %c0_67 = arith.constant 0 : index
    %164 = vector.load %arg5[%c0_64, %c0_65, %c0_66, %c0_67] : memref<1x2x8x128xf32, #tpu.memory_space<vmem>>, vector<1x1x8x128xf32>
    %165 = vector.shape_cast %164 : vector<1x1x8x128xf32> to vector<8x128xf32>
    %c0_68 = arith.constant 0 : index
    %c0_69 = arith.constant 0 : index
    %c0_70 = arith.constant 0 : index
    %c0_71 = arith.constant 0 : index
    %166 = vector.load %arg6[%c0_68, %c0_69, %c0_70, %c0_71] : memref<1x2x8x128xf32, #tpu.memory_space<vmem>>, vector<1x1x8x128xf32>
    %167 = vector.shape_cast %166 : vector<1x1x8x128xf32> to vector<8x128xf32>
    %168 = arith.subf %165, %167 : vector<8x128xf32>
    %169 = math.absf %168 : vector<8x128xf32>
    %c0_72 = arith.constant 0 : index
    %c1_73 = arith.constant 1 : index
    %c0_74 = arith.constant 0 : index
    %c0_75 = arith.constant 0 : index
    %170 = vector.load %arg5[%c0_72, %c1_73, %c0_74, %c0_75] : memref<1x2x8x128xf32, #tpu.memory_space<vmem>>, vector<1x1x8x128xf32>
    %171 = vector.shape_cast %170 : vector<1x1x8x128xf32> to vector<8x128xf32>
    %c0_76 = arith.constant 0 : index
    %c1_77 = arith.constant 1 : index
    %c0_78 = arith.constant 0 : index
    %c0_79 = arith.constant 0 : index
    %172 = vector.load %arg6[%c0_76, %c1_77, %c0_78, %c0_79] : memref<1x2x8x128xf32, #tpu.memory_space<vmem>>, vector<1x1x8x128xf32>
    %173 = vector.shape_cast %172 : vector<1x1x8x128xf32> to vector<8x128xf32>
    %174 = arith.subf %171, %173 : vector<8x128xf32>
    %175 = math.absf %174 : vector<8x128xf32>
    %176 = arith.addf %169, %175 : vector<8x128xf32>
    %177 = arith.mulf %176, %163 : vector<8x128xf32>
    %c0_80 = arith.constant 0 : index
    %c0_81 = arith.constant 0 : index
    %c0_82 = arith.constant 0 : index
    %c0_83 = arith.constant 0 : index
    %178 = vector.load %arg7[%c0_80, %c0_81, %c0_82, %c0_83] : memref<1x1x8x128xf32, #tpu.memory_space<vmem>>, vector<1x1x8x128xf32>
    %179 = vector.shape_cast %178 : vector<1x1x8x128xf32> to vector<8x128xf32>
    %180 = arith.addf %179, %161 : vector<8x128xf32>
    %c0_84 = arith.constant 0 : index
    %c0_85 = arith.constant 0 : index
    %c0_86 = arith.constant 0 : index
    %c0_87 = arith.constant 0 : index
    %181 = vector.load %arg7[%c0_84, %c0_85, %c0_86, %c0_87] : memref<1x1x8x128xf32, #tpu.memory_space<vmem>>, vector<1x1x8x128xf32>
    %182 = vector.shape_cast %181 : vector<1x1x8x128xf32> to vector<8x128xf32>
    %183 = vector.shape_cast %180 : vector<8x128xf32> to vector<1x1x8x128xf32>
    tpu.vector_store %arg7[%c0_84, %c0_85, %c0_86, %c0_87], %183 {strides = array<i32>} : memref<1x1x8x128xf32, #tpu.memory_space<vmem>>, vector<1x1x8x128xf32>,
    %c0_88 = arith.constant 0 : index
    %c0_89 = arith.constant 0 : index
    %c0_90 = arith.constant 0 : index
    %c0_91 = arith.constant 0 : index
    %184 = vector.load %arg8[%c0_88, %c0_89, %c0_90, %c0_91] : memref<1x1x8x128xf32, #tpu.memory_space<vmem>>, vector<1x1x8x128xf32>
    %185 = vector.shape_cast %184 : vector<1x1x8x128xf32> to vector<8x128xf32>
    %186 = arith.addf %185, %162 : vector<8x128xf32>
    %c0_92 = arith.constant 0 : index
    %c0_93 = arith.constant 0 : index
    %c0_94 = arith.constant 0 : index
    %c0_95 = arith.constant 0 : index
    %187 = vector.load %arg8[%c0_92, %c0_93, %c0_94, %c0_95] : memref<1x1x8x128xf32, #tpu.memory_space<vmem>>, vector<1x1x8x128xf32>
    %188 = vector.shape_cast %187 : vector<1x1x8x128xf32> to vector<8x128xf32>
    %189 = vector.shape_cast %186 : vector<8x128xf32> to vector<1x1x8x128xf32>
    tpu.vector_store %arg8[%c0_92, %c0_93, %c0_94, %c0_95], %189 {strides = array<i32>} : memref<1x1x8x128xf32, #tpu.memory_space<vmem>>, vector<1x1x8x128xf32>,
    %c0_96 = arith.constant 0 : index
    %c0_97 = arith.constant 0 : index
    %c0_98 = arith.constant 0 : index
    %c0_99 = arith.constant 0 : index
    %190 = vector.load %arg9[%c0_96, %c0_97, %c0_98, %c0_99] : memref<1x1x8x128xf32, #tpu.memory_space<vmem>>, vector<1x1x8x128xf32>
    %191 = vector.shape_cast %190 : vector<1x1x8x128xf32> to vector<8x128xf32>
    %192 = arith.addf %191, %163 : vector<8x128xf32>
    %c0_100 = arith.constant 0 : index
    %c0_101 = arith.constant 0 : index
    %c0_102 = arith.constant 0 : index
    %c0_103 = arith.constant 0 : index
    %193 = vector.load %arg9[%c0_100, %c0_101, %c0_102, %c0_103] : memref<1x1x8x128xf32, #tpu.memory_space<vmem>>, vector<1x1x8x128xf32>
    %194 = vector.shape_cast %193 : vector<1x1x8x128xf32> to vector<8x128xf32>
    %195 = vector.shape_cast %192 : vector<8x128xf32> to vector<1x1x8x128xf32>
    tpu.vector_store %arg9[%c0_100, %c0_101, %c0_102, %c0_103], %195 {strides = array<i32>} : memref<1x1x8x128xf32, #tpu.memory_space<vmem>>, vector<1x1x8x128xf32>,
    %c0_104 = arith.constant 0 : index
    %c0_105 = arith.constant 0 : index
    %c0_106 = arith.constant 0 : index
    %c0_107 = arith.constant 0 : index
    %196 = vector.load %arg10[%c0_104, %c0_105, %c0_106, %c0_107] : memref<1x1x8x128xf32, #tpu.memory_space<vmem>>, vector<1x1x8x128xf32>
    %197 = vector.shape_cast %196 : vector<1x1x8x128xf32> to vector<8x128xf32>
    %198 = arith.addf %197, %177 : vector<8x128xf32>
    %c0_108 = arith.constant 0 : index
    %c0_109 = arith.constant 0 : index
    %c0_110 = arith.constant 0 : index
    %c0_111 = arith.constant 0 : index
    %199 = vector.load %arg10[%c0_108, %c0_109, %c0_110, %c0_111] : memref<1x1x8x128xf32, #tpu.memory_space<vmem>>, vector<1x1x8x128xf32>
    %200 = vector.shape_cast %199 : vector<1x1x8x128xf32> to vector<8x128xf32>
    %201 = vector.shape_cast %198 : vector<8x128xf32> to vector<1x1x8x128xf32>
    tpu.vector_store %arg10[%c0_108, %c0_109, %c0_110, %c0_111], %201 {strides = array<i32>} : memref<1x1x8x128xf32, #tpu.memory_space<vmem>>, vector<1x1x8x128xf32>,
    return
  }
  func.func @transform_0(%arg0: i32, %arg1: i32, %arg2: i32) -> (i32, i32, i32, i32) {
    %c1_i32 = arith.constant 1 : i32
    %0 = arith.muli %arg1, %c1_i32 : i32
    %1 = arith.addi %0, %arg2 : i32
    %c0_i32 = arith.constant 0 : i32
    %c0_i32_0 = arith.constant 0 : i32
    %c0_i32_1 = arith.constant 0 : i32
    return %arg0, %c0_i32, %1, %c0_i32_0 : i32, i32, i32, i32
  }
  func.func @transform_1(%arg0: i32, %arg1: i32, %arg2: i32) -> (i32, i32, i32, i32) {
    %c1_i32 = arith.constant 1 : i32
    %0 = arith.muli %arg1, %c1_i32 : i32
    %1 = arith.addi %0, %arg2 : i32
    %c0_i32 = arith.constant 0 : i32
    %c0_i32_0 = arith.constant 0 : i32
    %c0_i32_1 = arith.constant 0 : i32
    return %arg0, %c0_i32, %1, %c0_i32_0 : i32, i32, i32, i32
  }
  func.func @transform_2(%arg0: i32, %arg1: i32, %arg2: i32) -> (i32, i32, i32, i32) {
    %c1_i32 = arith.constant 1 : i32
    %0 = arith.muli %arg1, %c1_i32 : i32
    %1 = arith.addi %0, %arg2 : i32
    %c0_i32 = arith.constant 0 : i32
    %c0_i32_0 = arith.constant 0 : i32
    %c0_i32_1 = arith.constant 0 : i32
    return %arg0, %c0_i32, %1, %c0_i32_0 : i32, i32, i32, i32
  }
  func.func @transform_3(%arg0: i32, %arg1: i32, %arg2: i32) -> (i32, i32, i32, i32) {
    %c1_i32 = arith.constant 1 : i32
    %0 = arith.muli %arg1, %c1_i32 : i32
    %1 = arith.addi %0, %arg2 : i32
    %c0_i32 = arith.constant 0 : i32
    %c0_i32_0 = arith.constant 0 : i32
    %c0_i32_1 = arith.constant 0 : i32
    return %arg0, %c0_i32, %1, %c0_i32_0 : i32, i32, i32, i32
  }
  func.func @transform_4(%arg0: i32, %arg1: i32, %arg2: i32) -> (i32, i32, i32, i32) {
    %c0_i32 = arith.constant 0 : i32
    %c0_i32_0 = arith.constant 0 : i32
    %c0_i32_1 = arith.constant 0 : i32
    return %arg0, %arg1, %c0_i32, %c0_i32_0 : i32, i32, i32, i32
  }
  func.func @transform_5(%arg0: i32, %arg1: i32, %arg2: i32) -> (i32, i32, i32, i32) {
    %c0_i32 = arith.constant 0 : i32
    %c0_i32_0 = arith.constant 0 : i32
    %c0_i32_1 = arith.constant 0 : i32
    return %arg0, %arg1, %c0_i32, %c0_i32_0 : i32, i32, i32, i32
  }
  func.func @transform_6(%arg0: i32, %arg1: i32, %arg2: i32) -> (i32, i32, i32, i32) {
    %c0_i32 = arith.constant 0 : i32
    %c0_i32_0 = arith.constant 0 : i32
    %c0_i32_1 = arith.constant 0 : i32
    return %arg0, %arg1, %c0_i32, %c0_i32_0 : i32, i32, i32, i32
  }
  func.func @transform_7(%arg0: i32, %arg1: i32, %arg2: i32) -> (i32, i32, i32, i32) {
    %c0_i32 = arith.constant 0 : i32
    %c0_i32_0 = arith.constant 0 : i32
    %c0_i32_1 = arith.constant 0 : i32
    return %arg0, %arg1, %c0_i32, %c0_i32_0 : i32, i32, i32, i32
  }
}

</mosaic_0001>

<bundles_post_ra>
// kernel: tpu_custom_call.1
= control target key start
LH: loop header
LB: loop body
LE: loop exit
PB: predicated region body
PF: predicated region fallthrough
CT: control target
= control target key end

     0   :  { %s2043_s0 = inlined_call_operand.hbm [shape: f32[2,4,8,128], index: 0, kind: input, shape index: {}]   ;;  %s2044_s1 = inlined_call_operand.hbm [shape: f32[2,4,8,128], index: 1, kind: input, shape index: {}]   ;;  %s2045_s2 = inlined_call_operand.hbm [shape: f32[2,2,8,128], index: 2, kind: input, shape index: {}]   ;;  %s2046_s3 = inlined_call_operand.hbm [shape: f32[2,2,8,128], index: 3, kind: input, shape index: {}]   ;;  %s2047_s4 = inlined_call_operand.hbm [shape: f32[2,1,8,128], index: 4, kind: output, shape index: {0}]   ;;  %s2048_s5 = inlined_call_operand.hbm [shape: f32[2,1,8,128], index: 5, kind: output, shape index: {1}]   ;;  %s2049_s6 = inlined_call_operand.hbm [shape: f32[2,1,8,128], index: 6, kind: output, shape index: {2}]   ;;  %s2050_s7 = inlined_call_operand.hbm [shape: f32[2,1,8,128], index: 7, kind: output, shape index: {3}]  }
   0x1   :  { %2066 = sst [smem:[#allocation27_spill]] %s2043_s0 }
   0x2   :  { %2067 = sst [smem:[#allocation28_spill]] %s2044_s1 }
   0x3   :  { %13 = vsyncpa [#allocation3], 0 }
   0x4   :  { %15 = vsyncpa [#allocation3 + $0x1], 0 }
   0x5   :  { %16 = vsyncpa [#allocation6], 0 }
   0x6   :  { %18 = vsyncpa [#allocation6 + $0x1], 0 }
   0x7   :  { %19 = vsyncpa [#allocation9], 0 }
   0x8   :  { %21 = vsyncpa [#allocation9 + $0x1], 0 }
   0x9   :  { %22 = vsyncpa [#allocation4], 0 }
   0xa   :  { %24 = vsyncpa [#allocation4 + $0x1], 0 }
   0xb   :  { %25 = vsyncpa [#allocation12], 0 }
   0xc   :  { %27 = vsyncpa [#allocation12 + $0x1], 0 }
   0xd   :  { %28 = vsyncpa [#allocation15], 0 }
   0xe   :  { %30 = vsyncpa [#allocation15 + $0x1], 0  ;;  %s1521_s24 = smov 0   ;;  %s1523_s25 = smov 0  }
   0xf   :  { %s1525_s26 = smov 0   ;;  %s1527_s27 = smov 0  }
  0x10   :  { %s1529_s28 = smov 0   ;;  %s1531_s29 = smov 0  }
  0x11 LB: > { %2068 = sst [smem:[#allocation22_spill]] %s1456_s26  ;;  %s1552_s30 = sadd.s32 4294967295, %s1468_s29   ;;  %s1468_s29 = sphi %s1531_s29, %s36_s29   ;;  %s1464_s28 = sphi %s1529_s28, %s2103_s28   ;;  %s1460_s27 = sphi %s1527_s27, %s2102_s27   ;;  %s1456_s26 = sphi %s1525_s26, %s2098_s26   ;;  %s1452_s25 = sphi %s1523_s25, %s2101_s25   ;;  %s1448_s24 = sphi %s1521_s24, %s2100_s24  }
  0x12   : > { %2069 = sst [smem:[#allocation23_spill]] %s1468_s29  ;;  %s2051_s8 = sadd.s32 4294967294, %s1468_s29  }
  0x13   : > { %s55_s9 = sadd.s32 1, %s1464_s28  ;;  %s66_s10 = sadd.s32 1, %s1456_s26 }
  0x14   : > { %p57_p0 = scmp.ge.s32.totalorder %s55_s9, 2  ;;  %p73_p1 = scmp.ne.s32.totalorder %s1456_s26, %s1452_s25 }
  0x15   : > { %p74_p2 = scmp.eq.s32.totalorder %s1468_s29, 0  ;;  %p79_p3 = scmp.ne.s32.totalorder %s1452_s25, %s1448_s24 }
  0x16   : > { %s2105_s9 = smov (%p57_p0, %s55_s9), 0  ;;  %p80_p5 = scmp.eq.s32.totalorder %s1552_s30, 0 }
  0x17   : > { %2070 = sst [smem:[#allocation24_spill]] %s2105_s9  ;;  %p1564_p4 = por %p74_p2, %p73_p1 }
  0x18   : > { %s61_s12 = ssub.s32 %s1464_s28, %s2105_s9  ;;  %p195_p6 = scmp.eq.s32.totalorder %s1552_s30, 1 }
  0x19   : > { %p64_p7 = scmp.eq.s32.totalorder %s61_s12, 0  ;;  %p1572_p8 = por %p80_p5, %p79_p3 }
  0x1a   : > { %p1576_p9 = por %p195_p6, %p73_p1  ;;  %p201_p10 = scmp.eq.s32.totalorder %s2051_s8, 1 }
  0x1b   : > { %s2072_s13 = scalar_select %p1572_p8, 1, 0 }
  0x1c   : > { %s2073_s14 = scalar_select %p1576_p9, 1, 0 }
  0x1d   : > { %s1583_s15 = scalar_select %p64_p7, %s1456_s26, %s66_s10  }
  0x1e   : > { %p1585_p11 = por %p201_p10, %p79_p3  ;;  %p1089_p13 = scmp.lt.s32.totalorder %s1468_s29, 2 }
  0x1f   : > { %2074 = sst [smem:[#allocation25_spill]] %s1583_s15  ;;  %s1592_s17 = sand.u32 1, %s1456_s26  }
  0x20   : > { %s2075_s16 = scalar_select %p1585_p11, 1, 0 }
  0x21   : > { %s2053_s18 = sshll.u32 %s1592_s17, 5  ;;  %s2054_s19 = sshll.u32 %s1464_s28, 9 }
  0x22   : > { %2076 = sst [smem:[#allocation26_spill]] %s2075_s16  ;;  %p1598_p0 = pnand %p1089_p13, %p1564_p4 }
  0x23   : > { %s328_s21 = sand.u32 1, %s1468_s29   ;;  %s2078_s1 = sld [smem:[#allocation28_spill]] }
  0x24   : > { %s332_s12 = scalar_lea.vmem [#allocation5], %s2053_s18  ;;  %s1616_s11 = scalar_lea.sflag [#allocation6], %s328_s21 }
  0x25   : > { %s341_s8 = sshll.u32 %s332_s12, 4  ;;  %p1622_p4 = pneg %p1598_p0  ;;  %s1613_s8 = int_to_ptr.vmem [resolvable:$true] %s341_s8 }
  0x29   : > { %s1608_s10 = scalar_lea.hbm %s2078_s1, %s2054_s19  ;;  %s1171_s12 = scalar_lea.hbm %s2078_s1, 1024 }
  0x2a   : > { %s1166_s9 = scalar_lea.hbm %s1608_s10, 512  ;;  %p1172_p7 = scmp.lt.u32.totalorder %s1608_s10, %s2078_s1 }
  0x2b   : > { %p1167_p3 = scmp.ne.s32.totalorder %s1608_s10, %s1166_s9  ;;  %p1173_p10 = scmp.lt.u32.totalorder %s1171_s12, %s1166_s9 }
  0x2c   : > { %p1175_p12 = scmp.lt.u32.totalorder %s1166_s9, %s1608_s10 }
  0x2d   : > { %p1169_p5 = pnand %p1622_p4, %p1167_p3  ;;  %p1174_p13 = por %p1173_p10, %p1172_p7 }
  0x2f   : > { %p1170_p6 = pneg %p1169_p5  ;;  %p1176_p1 = por %p1175_p12, %p1174_p13 }
  0x31   : > { %p1177_p2 = pnand %p1176_p1, %p1170_p6 }
  0x33   : > { %1180 = shalt.err (!%p1177_p2)
}
  0x34   : > { %s1181_s21 = scalar_lea.vmem %s1613_s8, 512  ;;  %s1470_s18 = smov [#allocation5]  }
  0x35   : > { %p1182_p3 = scmp.ne.s32.totalorder %s1613_s8, %s1181_s21  ;;  %s1186_s23 = sshll.u32 %s1470_s18, 4  ;;  %s1187_s23 = int_to_ptr.vmem [resolvable:$false] %s1186_s23 }
  0x36   : > { %s1188_s15 = scalar_lea.vmem %s1187_s23, 1024  ;;  %p1189_p9 = scmp.lt.s32.totalorder %s1613_s8, %s1187_s23 }
  0x37   : > { %p1184_p5 = pnand %p1182_p3, %p1622_p4  ;;  %p1190_p8 = scmp.lt.s32.totalorder %s1188_s15, %s1181_s21 }
  0x39   : > { %p1185_p11 = pneg %p1184_p5  ;;  %p1191_p7 = por %p1190_p8, %p1189_p9 }
  0x3b   : > { %p1192_p10 = pnand %p1191_p7, %p1185_p11 }
  0x3d   : > { %1195 = shalt.err (!%p1192_p10)
}
  0x3e   : > { %s2059_s9 = smov 128   ;;  %s2061_s19 = smov 8  }
  0x3f   : > { %1069 = dma.hbm_to_vmem [thread:$0]  (!%p1598_p0), %s1608_s10, 512, %s1613_s8, %s1616_s11, %s2059_s9, %s2059_s9, %s2061_s19  }
  0x40   : > { %p2080_p8 = scmp.lt.s32.totalorder %s1468_s29, 3  ;;  %p2081_p9 = scmp.ge.s32.totalorder %s1468_s29, 1 }
  0x41   : > { %s2083_s21 = sshll.u32 %s1464_s28, 9  ;;  %s2084_s0 = sld [smem:[#allocation27_spill]] }
  0x42   : > { %p1653_p11 = pnand %p2081_p9, %p2080_p8  ;;  %s2085_s1 = sshll.u32 %s1592_s17, 5 }
  0x43   : > { %s309_s26 = scalar_lea.vmem [#allocation2], %s2085_s1  ;;  %s2065_s8 = sshll.u32 %s1592_s17, 4 }
  0x44   : > { %s2082_s12 = scalar_select %p1653_p11, 1, 0 }
  0x45   : > { %s318_s16 = sshll.u32 %s309_s26, 4  ;;  %s306_s10 = scalar_lea.sflag [#allocation3], %s1592_s17  ;;  %s1667_s16 = int_to_ptr.vmem [resolvable:$true] %s318_s16 }
  0x47   : > { %s1662_s15 = scalar_lea.hbm %s2084_s0, %s2083_s21  ;;  %s1201_s21 = scalar_lea.hbm %s2084_s0, 1024 }
  0x48   : > { %s1196_s9 = scalar_lea.hbm %s1662_s15, 512  ;;  %p1202_p6 = scmp.lt.u32.totalorder %s1662_s15, %s2084_s0 }
  0x49   : > { %p1197_p12 = scmp.ne.s32.totalorder %s1662_s15, %s1196_s9  ;;  %p1203_p13 = scmp.lt.u32.totalorder %s1201_s21, %s1196_s9 }
  0x4a   : > { %p1205_p5 = scmp.lt.u32.totalorder %s1196_s9, %s1662_s15 }
  0x4b   : > { %p1199_p1 = pnand %p1197_p12, %p1622_p4  ;;  %p1204_p3 = por %p1203_p13, %p1202_p6 }
  0x4d   : > { %p1200_p2 = pneg %p1199_p1  ;;  %p1206_p7 = por %p1205_p5, %p1204_p3 }
  0x4f   : > { %p1207_p10 = pnand %p1206_p7, %p1200_p2 }
  0x51   : > { %1210 = shalt.err (!%p1207_p10)
}
  0x52   : > { %s1211_s1 = scalar_lea.vmem %s1667_s16, 512  ;;  %s1473_s26 = smov [#allocation2]  }
  0x53   : > { %p1212_p8 = scmp.ne.s32.totalorder %s1667_s16, %s1211_s1  ;;  %s1216_s19 = sshll.u32 %s1473_s26, 4  ;;  %s1217_s19 = int_to_ptr.vmem [resolvable:$false] %s1216_s19 }
  0x54   : > { %s1218_s29 = scalar_lea.vmem %s1217_s19, 1024  ;;  %p1219_p1 = scmp.lt.s32.totalorder %s1667_s16, %s1217_s19 }
  0x55   : > { %p1214_p9 = pnand %p1212_p8, %p1622_p4  ;;  %p1220_p11 = scmp.lt.s32.totalorder %s1218_s29, %s1211_s1 }
  0x57   : > { %p1215_p12 = pneg %p1214_p9  ;;  %p1221_p6 = por %p1220_p11, %p1219_p1 }
  0x59   : > { %p1222_p13 = pnand %p1221_p6, %p1215_p12 }
  0x5b   : > { %1225 = shalt.err (!%p1222_p13)
}
  0x5c   : > { %s2086_s9 = smov 8   ;;  %s2087_s18 = smov 128  }
  0x5d   : > { %1066 = dma.hbm_to_vmem [thread:$0]  (!%p1598_p0), %s1662_s15, 512, %s1667_s16, %s306_s10, %s2087_s18, %s2087_s18, %s2086_s9  }
  0x5e   : > { %s1045_s21 = sshll.u32 %s1464_s28, 8  ;;  %s355_s23 = scalar_lea.vmem [#allocation7], %s2065_s8 }
  0x5f   : > { %s364_s1 = sshll.u32 %s355_s23, 4  ;;  %s1704_s29 = scalar_lea.hbm %s2045_s2, %s1045_s21  ;;  %s1706_s1 = int_to_ptr.vmem [resolvable:$true] %s364_s1 }
  0x60   : > { %s1226_s0 = scalar_lea.hbm %s1704_s29, 256  ;;  %s1231_s10 = scalar_lea.hbm %s2045_s2, 512 }
  0x61   : > { %p1227_p11 = scmp.ne.s32.totalorder %s1704_s29, %s1226_s0  ;;  %p1232_p5 = scmp.lt.u32.totalorder %s1704_s29, %s2045_s2 }
  0x62   : > { %p1233_p7 = scmp.lt.u32.totalorder %s1231_s10, %s1226_s0  ;;  %p1235_p8 = scmp.lt.u32.totalorder %s1226_s0, %s1704_s29 }
  0x63   : > { %p1229_p2 = pnand %p1227_p11, %p1622_p4 }
  0x64   : > { %p1234_p10 = por %p1233_p7, %p1232_p5 }
  0x65   : > { %p1230_p3 = pneg %p1229_p2 }
  0x66   : > { %p1236_p9 = por %p1235_p8, %p1234_p10 }
  0x68   : > { %p1237_p12 = pnand %p1236_p9, %p1230_p3 }
  0x6a   : > { %1240 = shalt.err (!%p1237_p12)
}
  0x6b   : > { %s1241_s26 = scalar_lea.vmem %s1706_s1, 256  ;;  %s1474_s19 = smov [#allocation7]  }
  0x6c   : > { %p1242_p1 = scmp.ne.s32.totalorder %s1706_s1, %s1241_s26  ;;  %s1246_s16 = sshll.u32 %s1474_s19, 4  ;;  %s1247_s16 = int_to_ptr.vmem [resolvable:$false] %s1246_s16 }
  0x6d   : > { %s1248_s8 = scalar_lea.vmem %s1247_s16, 512  ;;  %p1249_p11 = scmp.lt.s32.totalorder %s1706_s1, %s1247_s16 }
  0x6e   : > { %p1244_p6 = pnand %p1242_p1, %p1622_p4  ;;  %p1250_p2 = scmp.lt.s32.totalorder %s1248_s8, %s1241_s26 }
  0x70   : > { %p1245_p13 = pneg %p1244_p6  ;;  %p1251_p5 = por %p1250_p2, %p1249_p11 }
  0x72   : > { %p1252_p7 = pnand %p1251_p5, %p1245_p13 }
  0x74   : > { %1255 = shalt.err (!%p1252_p7)
}
  0x75   : > { %1072 = dma.hbm_to_vmem [thread:$0]  (!%p1598_p0), %s1704_s29, 256, %s1706_s1, %s1616_s11, %s2087_s18, %s2087_s18, %s2086_s9  }
  0x76   : > { %s1738_s10 = scalar_lea.hbm %s2046_s3, %s1045_s21  ;;  %s2088_s23 = sshll.u32 %s1592_s17, 4 }
  0x77   : > { %s378_s26 = scalar_lea.vmem [#allocation8], %s2088_s23  ;;  %s375_s16 = scalar_lea.sflag [#allocation9], %s1592_s17 }
  0x78   : > { %s387_s19 = sshll.u32 %s378_s26, 4  ;;  %s1256_s8 = scalar_lea.hbm %s1738_s10, 256  ;;  %s1742_s19 = int_to_ptr.vmem [resolvable:$true] %s387_s19 }
  0x79   : > { %p1257_p3 = scmp.ne.s32.totalorder %s1738_s10, %s1256_s8  ;;  %s1261_s21 = scalar_lea.hbm %s2046_s3, 512 }
  0x7a   : > { %p1262_p9 = scmp.lt.u32.totalorder %s1738_s10, %s2046_s3  ;;  %p1263_p12 = scmp.lt.u32.totalorder %s1261_s21, %s1256_s8 }
  0x7b   : > { %p1259_p10 = pnand %p1257_p3, %p1622_p4  ;;  %p1265_p6 = scmp.lt.u32.totalorder %s1256_s8, %s1738_s10 }
  0x7c   : > { %p1264_p1 = por %p1263_p12, %p1262_p9 }
  0x7d   : > { %p1260_p8 = pneg %p1259_p10 }
  0x7e   : > { %p1266_p13 = por %p1265_p6, %p1264_p1 }
  0x80   : > { %p1267_p11 = pnand %p1266_p13, %p1260_p8 }
  0x82   : > { %1270 = shalt.err (!%p1267_p11)
}
  0x83   : > { %s1271_s15 = scalar_lea.vmem %s1742_s19, 256  ;;  %s1475_s23 = smov [#allocation8]  }
  0x84   : > { %p1272_p2 = scmp.ne.s32.totalorder %s1742_s19, %s1271_s15  ;;  %s1276_s26 = sshll.u32 %s1475_s23, 4  ;;  %s1277_s26 = int_to_ptr.vmem [resolvable:$false] %s1276_s26 }
  0x85   : > { %s1278_s11 = scalar_lea.vmem %s1277_s26, 512  ;;  %p1279_p3 = scmp.lt.s32.totalorder %s1742_s19, %s1277_s26 }
  0x86   : > { %p1274_p5 = pnand %p1272_p2, %p1622_p4  ;;  %p1280_p10 = scmp.lt.s32.totalorder %s1278_s11, %s1271_s15 }
  0x88   : > { %p1275_p7 = pneg %p1274_p5  ;;  %p1281_p9 = por %p1280_p10, %p1279_p3 }
  0x8a   : > { %p1282_p12 = pnand %p1281_p9, %p1275_p7 }
  0x8c   : > { %1285 = shalt.err (!%p1282_p12)
}
  0x8d   : > { %1075 = dma.hbm_to_vmem [thread:$0]  (!%p1598_p0), %s1738_s10, 256, %s1742_s19, %s375_s16, %s2087_s18, %s2087_s18, %s2086_s9  }
  0x8e   : > { %p2089_p4 = scmp.ne.s32.totalorder %s2082_s12, 0 }
  0x8f   : > { %s1774_s22 = sand.u32 (!%p2089_p4), 1, %s1452_s25   ;;  %p2090_p8 = scmp.ne.s32.totalorder (!%p2089_p4), %s2072_s13, 0 }
  0x90   : > { %399 = sbr.rel (%p2089_p4) target bundleno = 278 (0x116), region = 36  ;;  %s1009_s8 = sshll.u32 (!%p2089_p4), %s1774_s22, 5 }
  0x91   : > { %s402_s1 = scalar_lea.sflag (!%p2089_p4), [#allocation3], %s1774_s22  ;;  %s405_s20 = scalar_lea.vmem (!%p2089_p4), [#allocation2], %s1009_s8 }
  0x97   : > { %1423 = dma.done.wait (%p2090_p8), %s402_s1, 512  }
  0x98   : > { %1425 = vsyncadd (%p2090_p8), %s402_s1, 4294966784  ;;  %s410_s17 = sand.u32 1, %s1552_s30   ;;  %s1785_s9 = scalar_lea.vmem [#allocation5], %s1009_s8 }
  0x99   : > { %s411_s12 = scalar_lea.sflag [#allocation6], %s410_s17 }
  0x9a   : > { %1427 = dma.done.wait (%p2090_p8), %s411_s12, 768  }
  0x9b   : > { %1429 = vsyncadd (%p2090_p8), %s411_s12, 4294966528  ;;  %s1011_s18 = sshll.u32 %s1774_s22, 4  ;;  %s429_s19 = scalar_lea.sflag [#allocation9], %s1774_s22 }
  0x9c   : > { %s1792_s10 = scalar_lea.vmem [#allocation7], %s1011_s18  ;;  %s1795_s16 = scalar_lea.vmem [#allocation8], %s1011_s18 }
  0x9d   : > { %1431 = dma.done.wait (%p2090_p8), %s429_s19, 256  }
  0x9e   : > { %1433 = vsyncadd (%p2090_p8), %s429_s19, 4294967040  ;;  %v1801_v0 = vld [vmem:[%s405_s20] sm:$0xff]  ;;  %v1806_v2 = vld [vmem:[%s405_s20 + $0x8] sm:$0xff]  ;;  %s1809_s21 = sshll.u32 %s1774_s22, 3  ;;  %v1476_v7 = vmov 0.0   ;;  %s1853_s13 = sshll.u32 %s1460_s27, 7 }
  0x9f   : > { %v1804_v1 = vld [vmem:[%s1785_s9] sm:$0xff]  ;;  %v1017_v3 = vclamps-f32 %v1801_v0, 30.0  ;;  %v1814_v4 = vld [vmem:[%s1785_s9 + $0x8] sm:$0xff]  ;;  %v1021_v5 = vclamps-f32 %v1806_v2, 30.0  ;;  %v1817_v6 = vld [vmem:[%s405_s20 + $0x10] sm:$0xff]  ;;  %s478_s29 = scalar_lea.vmem [#allocation11], %s1809_s21  ;;  %s1866_s23 = scalar_lea.hbm %s2048_s5, %s1853_s13 }
  0xa0   : > { %vm519_vm0 = vcmp.eq.f32.partialorder %v1804_v1, 1.0  ;;  %vm551_vm1 = vcmp.eq.f32.partialorder %v1814_v4, 1.0  ;;  %v1823_v9 = vld [vmem:[%s1785_s9 + $0x10] sm:$0xff]  ;;  %v1025_v10 = vclamps-f32 %v1817_v6, 30.0  ;;  %v1826_v11 = vld [vmem:[%s405_s20 + $0x18] sm:$0xff]  ;;  %s708_s0 = sshll.u32 %s478_s29, 4  ;;  %v569_v32 = vadd.f32 %v1814_v4, %v1804_v1  ;;  %s1868_s0 = int_to_ptr.vmem [resolvable:$true] %s708_s0 }
  0xa1   : > { %v1819_v8 = vsel %vm519_vm0, 1.0, %v1476_v7  ;;  %v509_v12 = vsub.f32 0.0, %v1017_v3  ;;  %v541_v13 = vsub.f32 0.0, %v1021_v5  ;;  %v1832_v14 = vsel %vm551_vm1, 1.0, %v1476_v7  ;;  %v1842_v18 = vld [vmem:[%s1785_s9 + $0x18] sm:$0xff]  ;;  %v640_v26 = vld [vmem:[%s1792_s10] sm:$0xff] }
  0xa2   : > { %vm586_vm2 = vcmp.eq.f32.partialorder %v1823_v9, 1.0  ;;  %v568_v15 = vadd.f32 %v1832_v14, %v1819_v8  ;;  %v576_v16 = vsub.f32 0.0, %v1025_v10  ;;  %v1029_v21 = vclamps-f32 %v1826_v11, 30.0  ;;  %v641_v28 = vld [vmem:[%s1795_s16] sm:$0xff]  ;;  %v1031_v29 = vld [vmem:[%s1792_s10 + $0x8] sm:$0xff]  ;;  %s485_s26 = scalar_lea.vmem [#allocation13], %s1809_s21 }
  0xa3   : > { %v1839_v17 = vsel %vm586_vm2, 1.0, %v1476_v7  ;;  %v510_v19 = vmul.f32 1.442695, %v509_v12  ;;  %v542_v20 = vmul.f32 1.442695, %v541_v13  ;;  %vm621_vm3 = vcmp.eq.f32.partialorder %v1842_v18, 1.0 }
  0xa4   : > { %v577_v22 = vmul.f32 1.442695, %v576_v16  ;;  %v603_v23 = vadd.f32 %v1839_v17, %v568_v15  ;;  %v611_v24 = vsub.f32 0.0, %v1029_v21  ;;  %v1849_v25 = vsel %vm621_vm3, 1.0, %v1476_v7  ;;  %v1032_v30 = vld [vmem:[%s1795_s16 + $0x8] sm:$0xff]  ;;  %s1873_s11 = sshll.u32 %s485_s26, 4  ;;  %s1907_s11 = int_to_ptr.vmem [resolvable:$true] %s1873_s11 }
  0xa5   : > { %1142 = vpow2.f32 %v510_v19  ;;  %v642_v33 = vsub.f32 %v640_v26, %v641_v28  ;;  %v648_v34 = vsub.f32 %v1031_v29, %v1032_v30  ;;  %v604_v35 = vadd.f32 %v1823_v9, %v569_v32  ;;  %s1878_s8 = scalar_lea.sflag [#allocation12], %s410_s17  ;;  %s1286_s1 = scalar_lea.vmem %s1868_s0, 128 }
  0xa6   : > { %1144 = vpow2.f32 %v542_v20  ;;  %v638_v27 = vadd.f32 %v1849_v25, %v603_v23  ;;  %v612_v31 = vmul.f32 1.442695, %v611_v24  ;;  %p1287_p0 = scmp.ne.s32.totalorder %s1868_s0, %s1286_s1  ;;  %p2091_p1 = scmp.ne.s32.totalorder %s2073_s14, 0 }
  0xa7   : > { %1146 = vpow2.f32 %v577_v22  ;;  %v643_v36 = vand.u32 2147483647, %v642_v33  ;;  %v649_v37 = vand.u32 2147483647, %v648_v34  ;;  %s1477_s20 = smov [#allocation11]  }
  0xa8   : > { %1148 = vpow2.f32 %v612_v31  ;;  %657 = vst [vmem:[%s478_s29] sm:$0xff] %v638_v27  ;;  %p1288_p6 = pnand %p1287_p0, %p2091_p1  ;;  %s1290_s12 = sshll.u32 %s1477_s20, 4  ;;  %s1291_s12 = int_to_ptr.vmem [resolvable:$false] %s1290_s12 }
  0xa9   : > { %s1292_s9 = scalar_lea.vmem %s1291_s12, 256  ;;  %p1293_p11 = scmp.lt.s32.totalorder %s1868_s0, %s1291_s12 }
  0xaa   : > { %p1289_p13 = pneg %p1288_p6  ;;  %p1294_p2 = scmp.lt.s32.totalorder %s1292_s9, %s1286_s1 }
  0xac   : > { %p1295_p5 = por %p1294_p2, %p1293_p11 }
  0xae   : > { %p1296_p7 = pnand %p1295_p5, %p1289_p13 }
  0xb0   : > { %1299 = shalt.err (!%p1296_p7)
}
  0xb1   : > { %s1300_s30 = scalar_lea.hbm %s1866_s23, 128  ;;  %s1304_s10 = scalar_lea.hbm %s2048_s5, 256 }
  0xb2   : > { %p1301_p3 = scmp.ne.s32.totalorder %s1866_s23, %s1300_s30  ;;  %p1305_p12 = scmp.lt.u32.totalorder %s1866_s23, %s2048_s5 }
  0xb3   : > { %p1306_p4 = scmp.lt.u32.totalorder %s1304_s10, %s1300_s30  ;;  %p1308_p0 = scmp.lt.u32.totalorder %s1300_s30, %s1866_s23 }
  0xb4   : > { %p1302_p10 = pnand %p1301_p3, %p2091_p1 }
  0xb5   : > { %p1307_p8 = por %p1306_p4, %p1305_p12 }
  0xb6   : > { %p1303_p9 = pneg %p1302_p10 }
  0xb7   : > { %p1309_p6 = por %p1308_p0, %p1307_p8 }
  0xb9   : > { %p1310_p13 = pnand %p1309_p6, %p1303_p9 }
  0xbb   : > { %1313 = shalt.err (!%p1310_p13)
}
  0xbc   : > { %1056 = dma.vmem_to_hbm [thread:$0]  (%p2091_p1), %s1868_s0, 128, %s1866_s23, %s1878_s8   ;;  %v639_v38 = vadd.f32 %v1842_v18, %v604_v35  ;;  %v650_v39 = vadd.f32 %v649_v37, %v643_v36  ;;  %v1143_v40 = vpop.eup %1142 }
  0xbd   : > { %s492_s29 = scalar_lea.vmem [#allocation14], %s1809_s21  ;;  %s1913_s20 = scalar_lea.hbm %s2049_s6, %s1853_s13  ;;  %v1145_v42 = vpop.eup %1144  ;;  %v512_v43 = vadd.f32 1.0, %v1143_v40 }
  0xbe   : > { %s736_s27 = sshll.u32 %s492_s29, 4  ;;  %v651_v41 = vmul.f32 %v650_v39, %v639_v38  ;;  %s1919_s23 = scalar_lea.hbm %s2050_s7, %s1853_s13  ;;  %660 = vst [vmem:[%s485_s26] sm:$0xff] %v639_v38  ;;  %v1147_v44 = vpop.eup %1146  ;;  %v544_v45 = vadd.f32 1.0, %v1145_v42  ;;  %s1923_s27 = int_to_ptr.vmem [resolvable:$true] %s736_s27 }
  0xbf   : > { %s1314_s9 = scalar_lea.vmem %s1907_s11, 128  ;;  %s1478_s30 = smov [#allocation13]  }
  0xc0   : > { %p1315_p11 = scmp.ne.s32.totalorder %s1907_s11, %s1314_s9  ;;  %s1318_s17 = sshll.u32 %s1478_s30, 4  ;;  %s1319_s17 = int_to_ptr.vmem [resolvable:$false] %s1318_s17 }
  0xc1   : > { %s1320_s18 = scalar_lea.vmem %s1319_s17, 256  ;;  %p1321_p7 = scmp.lt.s32.totalorder %s1907_s11, %s1319_s17 }
  0xc2   : > { %p1316_p2 = pnand %p1315_p11, %p2091_p1  ;;  %p1322_p3 = scmp.lt.s32.totalorder %s1320_s18, %s1314_s9 }
  0xc4   : > { %p1317_p5 = pneg %p1316_p2  ;;  %p1323_p10 = por %p1322_p3, %p1321_p7 }
  0xc6   : > { %p1324_p9 = pnand %p1323_p10, %p1317_p5 }
  0xc8   : > { %1327 = shalt.err (!%p1324_p9)
}
  0xc9   : > { %s1328_s26 = scalar_lea.hbm %s1913_s20, 128  ;;  %s1332_s16 = scalar_lea.hbm %s2049_s6, 256 }
  0xca   : > { %p1329_p12 = scmp.ne.s32.totalorder %s1913_s20, %s1328_s26  ;;  %p1333_p0 = scmp.lt.u32.totalorder %s1913_s20, %s2049_s6 }
  0xcb   : > { %p1334_p6 = scmp.lt.u32.totalorder %s1332_s16, %s1328_s26  ;;  %p1336_p11 = scmp.lt.u32.totalorder %s1328_s26, %s1913_s20 }
  0xcc   : > { %p1330_p4 = pnand %p1329_p12, %p2091_p1 }
  0xcd   : > { %p1335_p13 = por %p1334_p6, %p1333_p0 }
  0xce   : > { %p1331_p8 = pneg %p1330_p4 }
  0xcf   : > { %p1337_p2 = por %p1336_p11, %p1335_p13 }
  0xd1   : > { %p1338_p5 = pnand %p1337_p2, %p1331_p8 }
  0xd3   : > { %1341 = shalt.err (!%p1338_p5)
}
  0xd4   : > { %1057 = dma.vmem_to_hbm [thread:$0]  (%p2091_p1), %s1907_s11, 128, %s1913_s20, %s1878_s8   ;;  %1150 = vrcp.f32 %v512_v43  ;;  %v579_v46 = vadd.f32 1.0, %v1147_v44  ;;  %v1149_v47 = vpop.eup %1148  ;;  %663 = vst [vmem:[%s492_s29] sm:$0xff] %v651_v41 }
  0xd5   : > { %1152 = vlog2.f32 %v512_v43  ;;  %v614_v48 = vadd.f32 1.0, %v1149_v47  ;;  %s680_s12 = scalar_lea.sflag [#allocation15], %s1774_s22  ;;  %s1342_s0 = scalar_lea.vmem %s1923_s27, 128 }
  0xd6   : > { %1154 = vrcp.f32 %v544_v45  ;;  %p1343_p7 = scmp.ne.s32.totalorder %s1923_s27, %s1342_s0  ;;  %s1479_s9 = smov [#allocation14]  }
  0xd7   : > { %s1346_s30 = sshll.u32 %s1479_s9, 4  ;;  %s1347_s30 = int_to_ptr.vmem [resolvable:$false] %s1346_s30 }
  0xd8   : > { %p1344_p3 = pnand %p1343_p7, %p2091_p1  ;;  %s1348_s17 = scalar_lea.vmem %s1347_s30, 256 }
  0xd9   : > { %p1349_p9 = scmp.lt.s32.totalorder %s1923_s27, %s1347_s30  ;;  %p1350_p12 = scmp.lt.s32.totalorder %s1348_s17, %s1342_s0 }
  0xda   : > { %p1345_p10 = pneg %p1344_p3 }
  0xdb   : > { %p1351_p4 = por %p1350_p12, %p1349_p9 }
  0xdd   : > { %p1352_p8 = pnand %p1351_p4, %p1345_p10 }
  0xdf   : > { %1355 = shalt.err (!%p1352_p8)
}
  0xe0   : > { %s1356_s11 = scalar_lea.hbm %s1919_s23, 128  ;;  %s1360_s20 = scalar_lea.hbm %s2050_s7, 256 }
  0xe1   : > { %p1357_p0 = scmp.ne.s32.totalorder %s1919_s23, %s1356_s11  ;;  %p1361_p11 = scmp.lt.u32.totalorder %s1919_s23, %s2050_s7 }
  0xe2   : > { %p1362_p2 = scmp.lt.u32.totalorder %s1360_s20, %s1356_s11  ;;  %p1364_p7 = scmp.lt.u32.totalorder %s1356_s11, %s1919_s23 }
  0xe3   : > { %p1358_p6 = pnand %p1357_p0, %p2091_p1 }
  0xe4   : > { %p1363_p5 = por %p1362_p2, %p1361_p11 }
  0xe5   : > { %p1359_p13 = pneg %p1358_p6 }
  0xe6   : > { %p1365_p3 = por %p1364_p7, %p1363_p5 }
  0xe8   : > { %p1366_p10 = pnand %p1365_p3, %p1359_p13 }
  0xea   : > { %1369 = shalt.err (!%p1366_p10)
}
  0xeb   : > { %1058 = dma.vmem_to_hbm [thread:$0]  (%p2091_p1), %s1923_s27, 128, %s1919_s23, %s680_s12   ;;  %1156 = vlog2.f32 %v544_v45  ;;  %v527_v49 = vsub.f32 1.0, %v1804_v1  ;;  %v559_v50 = vsub.f32 1.0, %v1814_v4  ;;  %v594_v51 = vsub.f32 1.0, %v1823_v9  ;;  %v1151_v55 = vpop.eup %1150 }
  0xec   : > { %1158 = vrcp.f32 %v579_v46  ;;  %v629_v52 = vsub.f32 1.0, %v1842_v18  ;;  %v1153_v57 = vpop.eup %1152  ;;  %v522_v58 = vsub.f32 1.0, %v1151_v55  ;;  %v529_v59 = vmul.f32 %v1151_v55, %v1151_v55  ;;  %s471_s27 = scalar_lea.vmem [#allocation10], %s1809_s21  ;;  %s1992_s16 = scalar_lea.hbm %s2047_s4, %s1853_s13 }
  0xed   : > { %1160 = vlog2.f32 %v579_v46  ;;  %v528_v53 = vmul.f32 %v527_v49, %v527_v49  ;;  %v560_v54 = vmul.f32 %v559_v50, %v559_v50  ;;  %v595_v56 = vmul.f32 %v594_v51, %v594_v51  ;;  %v1155_v60 = vpop.eup %1154  ;;  %s694_s23 = sshll.u32 %s471_s27, 4  ;;  %s665_s15 = scalar_lea.sflag [#allocation4], %s1774_s22  ;;  %s1994_s23 = int_to_ptr.vmem [resolvable:$true] %s694_s23 }
  0xee   : > { %1162 = vrcp.f32 %v614_v48  ;;  %v516_v61 = vmul.f32 0.6931472, %v1153_v57  ;;  %v630_v63 = vmul.f32 %v629_v52, %v629_v52  ;;  %v523_v4 = vmul.f32 %v522_v58, %v522_v58  ;;  %s1370_s1 = scalar_lea.vmem %s1994_s23, 128  ;;  %s1480_s21 = smov [#allocation10]  }
  0xef   : > { %1164 = vlog2.f32 %v614_v48  ;;  %v532_v62 = vmul.f32 %v528_v53, %v528_v53  ;;  %v554_v7 = vsub.f32 1.0, %v1155_v60  ;;  %v561_v12 = vmul.f32 %v1155_v60, %v1155_v60  ;;  %p1371_p9 = scmp.ne.s32.totalorder %s1994_s23, %s1370_s1  ;;  %s1374_s12 = sshll.u32 %s1480_s21, 4  ;;  %s1375_s12 = int_to_ptr.vmem [resolvable:$false] %s1374_s12 }
  0xf0   : > { %v564_v9 = vmul.f32 %v560_v54, %v560_v54  ;;  %v517_v15 = vsub.f32 0.0, %v516_v61  ;;  %v530_v18 = vmul.f32 %v1151_v55, %v529_v59  ;;  %v599_v19 = vmul.f32 %v595_v56, %v595_v56  ;;  %s1376_s0 = scalar_lea.vmem %s1375_s12, 256  ;;  %p1377_p8 = scmp.lt.s32.totalorder %s1994_s23, %s1375_s12 }
  0xf1   : > { %v524_v22 = vmul.f32 %v523_v4, %v522_v58  ;;  %v555_v23 = vmul.f32 %v554_v7, %v554_v7  ;;  %v562_v26 = vmul.f32 %v1155_v60, %v561_v12  ;;  %p1372_p12 = pnand %p1371_p9, %p2091_p1  ;;  %p1378_p0 = scmp.lt.s32.totalorder %s1376_s0, %s1370_s1 }
  0xf2   : > { %v518_v30 = vsub.f32 %v517_v15, %v1017_v3 }
  0xf3   : > { %v525_v33 = vmul.f32 %v524_v22, %v517_v15  ;;  %v556_v34 = vmul.f32 %v555_v23, %v554_v7  ;;  %p1373_p4 = pneg %p1372_p12  ;;  %p1379_p6 = por %p1378_p0, %p1377_p8 }
  0xf4   : > { %v531_v39 = vmul.f32 %v530_v18, %v518_v30 }
  0xf5   : > { %v1157_v1 = vpop.eup %1156  ;;  %v526_v41 = vmul.f32 %v1819_v8, %v525_v33  ;;  %p1380_p13 = pnand %p1379_p6, %p1373_p4 }
  0xf6   : > { %v1159_v13 = vpop.eup %1158  ;;  %v548_v16 = vmul.f32 0.6931472, %v1157_v1  ;;  %v533_v0 = vmul.f32 %v532_v62, %v531_v39 }
  0xf7   : > { %v1161_v20 = vpop.eup %1160  ;;  %v589_v24 = vsub.f32 1.0, %v1159_v13  ;;  %v596_v31 = vmul.f32 %v1159_v13, %v1159_v13 }
  0xf8   : > { %v1163_v27 = vpop.eup %1162  ;;  %v549_v28 = vsub.f32 0.0, %v548_v16  ;;  %v583_v29 = vmul.f32 0.6931472, %v1161_v20  ;;  %v534_v51 = vadd.f32 %v533_v0, %v526_v41 }
  0xf9   : > { %v1165_v32 = vpop.eup %1164  ;;  %v590_v35 = vmul.f32 %v589_v24, %v589_v24  ;;  %v624_v36 = vsub.f32 1.0, %v1163_v27  ;;  %v597_v50 = vmul.f32 %v1159_v13, %v596_v31 }
  0xfa   : > { %v584_v37 = vsub.f32 0.0, %v583_v29  ;;  %v618_v38 = vmul.f32 0.6931472, %v1165_v32  ;;  %v550_v40 = vsub.f32 %v549_v28, %v1021_v5  ;;  %v557_v42 = vmul.f32 %v556_v34, %v549_v28 }
  0xfb   : > { %v591_v43 = vmul.f32 %v590_v35, %v589_v24  ;;  %v625_v44 = vmul.f32 %v624_v36, %v624_v36  ;;  %v631_v5 = vmul.f32 %v1163_v27, %v1163_v27 }
  0xfc   : > { %v619_v45 = vsub.f32 0.0, %v618_v38  ;;  %v563_v3 = vmul.f32 %v562_v26, %v550_v40  ;;  %v585_v46 = vsub.f32 %v584_v37, %v1025_v10  ;;  %v558_v47 = vmul.f32 %v1832_v14, %v557_v42 }
  0xfd   : > { %v592_v48 = vmul.f32 %v591_v43, %v584_v37  ;;  %v626_v49 = vmul.f32 %v625_v44, %v624_v36  ;;  %v632_v6 = vmul.f32 %v1163_v27, %v631_v5  ;;  %v634_v10 = vmul.f32 %v630_v63, %v630_v63 }
  0xfe   : > { %v565_v52 = vmul.f32 %v564_v9, %v563_v3  ;;  %v620_v2 = vsub.f32 %v619_v45, %v1029_v21  ;;  %v598_v54 = vmul.f32 %v597_v50, %v585_v46 }
  0xff   : > { %v593_v8 = vmul.f32 %v1839_v17, %v592_v48  ;;  %v627_v53 = vmul.f32 %v626_v49, %v619_v45 }
 0x100   : > { %v566_v55 = vadd.f32 %v565_v52, %v558_v47  ;;  %v600_v14 = vmul.f32 %v599_v19, %v598_v54  ;;  %v633_v58 = vmul.f32 %v632_v6, %v620_v2 }
 0x101   : > { %v628_v56 = vmul.f32 %v1849_v25, %v627_v53 }
 0x102   : > { %v567_v57 = vadd.f32 %v566_v55, %v534_v51  ;;  %v601_v59 = vadd.f32 %v600_v14, %v593_v8  ;;  %v635_v11 = vmul.f32 %v634_v10, %v633_v58 }
 0x104   : > { %v602_v21 = vadd.f32 %v601_v59, %v567_v57  ;;  %v636_v60 = vadd.f32 %v635_v11, %v628_v56 }
 0x106   : > { %v637_v17 = vadd.f32 %v636_v60, %v602_v21 }
 0x108   : > { %654 = vst [vmem:[%s471_s27] sm:$0xff] %v637_v17 }
 0x109   : > { %1383 = shalt.err (!%p1380_p13)
}
 0x10a   : > { %s1384_s22 = scalar_lea.hbm %s1992_s16, 128  ;;  %s1388_s30 = scalar_lea.hbm %s2047_s4, 256 }
 0x10b   : > { %p1385_p11 = scmp.ne.s32.totalorder %s1992_s16, %s1384_s22  ;;  %p1389_p7 = scmp.lt.u32.totalorder %s1992_s16, %s2047_s4 }
 0x10c   : > { %p1390_p3 = scmp.lt.u32.totalorder %s1388_s30, %s1384_s22  ;;  %p1392_p9 = scmp.lt.u32.totalorder %s1384_s22, %s1992_s16 }
 0x10d   : > { %p1386_p2 = pnand %p1385_p11, %p2091_p1 }
 0x10e   : > { %p1391_p10 = por %p1390_p3, %p1389_p7 }
 0x10f   : > { %p1387_p5 = pneg %p1386_p2 }
 0x110   : > { %p1393_p12 = por %p1392_p9, %p1391_p10 }
 0x112   : > { %p1394_p4 = pnand %p1393_p12, %p1387_p5 }
 0x114   : > { %1397 = shalt.err (!%p1394_p4)
}
 0x115   : > { %1055 = dma.vmem_to_hbm [thread:$0]  (%p2091_p1), %s1994_s23, 128, %s1992_s16, %s665_s15  }
 0x116 PF: > { %s2092_s8 = sld [smem:[#allocation26_spill]]  ;;  %s2093_s29 = sld [smem:[#allocation23_spill]] }
 0x117   : > { %s748_s20 = sand.u32 1, %s1448_s24  }
 0x118   : > { %s749_s18 = scalar_lea.sflag [#allocation4], %s748_s20 }
 0x11c   : > { %p2094_p8 = scmp.ne.s32.totalorder %s2092_s8, 0  ;;  %p2095_p0 = scmp.ge.s32.totalorder %s2093_s29, 2 }
 0x11e   : > { %p1077_p6 = pnand %p2095_p0, %p2094_p8 }
 0x120   : > { %1435 = dma.done.wait (!%p1077_p6), %s749_s18, 128  }
 0x121   : > { %1437 = vsyncadd (!%p1077_p6), %s749_s18, 4294967168  ;;  %s2096_s26 = sadd.s32 4294967294, %s2093_s29  }
 0x122   : > { %s757_s27 = sand.u32 1, %s2096_s26  }
 0x123   : > { %s758_s10 = scalar_lea.sflag [#allocation12], %s757_s27 }
 0x124   : > { %1439 = dma.done.wait (!%p1077_p6), %s758_s10, 256  }
 0x125   : > { %1441 = vsyncadd (!%p1077_p6), %s758_s10, 4294967040  ;;  %s776_s14 = scalar_lea.sflag [#allocation15], %s748_s20 }
 0x126   : > { %1443 = dma.done.wait (!%p1077_p6), %s776_s14, 128  }
 0x127   : > { %1445 = vsyncadd (!%p1077_p6), %s776_s14, 4294967168  ;;  %s36_s29 = sadd.s32 1, %s2093_s29   ;;  %s2097_s23 = sld [smem:[#allocation22_spill]] }
 0x128   : > { %p33_p1 = scmp.ge.s32.totalorder %s36_s29, 4   ;;  %s2098_s26 = sld [smem:[#allocation25_spill]] }
 0x129   : > { %s2099_s19 = sld [smem:[#allocation24_spill]]  ;;  %s2100_s24 = smov %s1452_s25 }
 0x12a   : > { %s2102_s27 = smov %s1464_s28  ;;  %35 = sbr.rel (!%p33_p1) target bundleno = 17 (0x11), region = 179 }
 0x12d   : > { %s2101_s25 = smov %s2097_s23 }
 0x12f   : > { %s2103_s28 = smov %s2099_s19 }
 0x131   :  { %781 = vsyncpa [#allocation3], 1 }
 0x132   :  { %783 = vsyncpa [#allocation3 + $0x1], 1 }
 0x133   :  { %784 = vsyncpa [#allocation6], 1 }
 0x134   :  { %786 = vsyncpa [#allocation6 + $0x1], 1 }
 0x135   :  { %787 = vsyncpa [#allocation9], 1 }
 0x136   :  { %789 = vsyncpa [#allocation9 + $0x1], 1 }
 0x137   :  { %790 = vsyncpa [#allocation4], 1 }
 0x138   :  { %792 = vsyncpa [#allocation4 + $0x1], 1 }
 0x139   :  { %793 = vsyncpa [#allocation12], 1 }
 0x13a   :  { %795 = vsyncpa [#allocation12 + $0x1], 1 }
 0x13b   :  { %796 = vsyncpa [#allocation15], 1 }
 0x13c   :  { %798 = vsyncpa [#allocation15 + $0x1], 1 }

</bundles_post_ra>
